<compile_context>
chip_gen: v5e
topology: v5e:2x2
jax: 0.10.0
libtpu: 0.0.40
codegen_flags: <defaults>
</compile_context>

<pallas_src>
import functools

import jax
import jax.numpy as jnp
from jax.experimental import pallas as pl
from jax.experimental.pallas import tpu as pltpu


# Contract the last dims of both operands: A (M, K) . B (N, K)^T -> (M, N).
# Same dimension numbers the TPU flash-attention kernels use for q @ k^T.
_NT_DIMS = (((1,), (1,)), ((), ()))


# ---------------------------------------------------------------------------
# Kernel
# ---------------------------------------------------------------------------
def _critic_kernel(obs_ref, p1_ref, p2_ref, w_in_ref, b_in_ref,
                   w_all_ref, b_all_ref, w_out_ref, b_out_ref, out_ref):
    f32 = jnp.float32
    tb = out_ref.shape[-1]

    # In-kernel lane concat of the three activation tiles -> (TB, d_obs+d_p1+d_p2).
    # Keeps a single MXU push stream (block-diagonal weight) instead of 3 dots,
    # and avoids materializing the concatenated activations in HBM.
    x = jnp.concatenate([obs_ref[...], p1_ref[...], p2_ref[...]], axis=-1)

    # Fused input stage: (TB, D) @ (D, 3H) + (1, 3H)  ==  concat(obs_h, p1_h, p2_h).
    h = jnp.dot(x, w_in_ref[...], preferred_element_type=f32) + b_in_ref[...]
    h = jnp.maximum(h, 0.0).astype(w_all_ref.dtype)   # cast only matters in bf16 mode

    # all_hidden_layer: (TB, 3H) @ (3H, H) + (1, H).
    h = jnp.dot(h, w_all_ref[...], preferred_element_type=f32) + b_all_ref[...]
    h = jnp.maximum(h, 0.0)

    # output_layer (out_features=1), produced LANE-DENSE:
    #   (1, H) . (TB, H)^T -> (1, TB); bias is a scalar read from SMEM.
    row = jax.lax.dot_general(w_out_ref[...], h, _NT_DIMS, preferred_element_type=f32)
    out_ref[...] = (row + b_out_ref[0, 0]).reshape(1, 1, tb)


# ---------------------------------------------------------------------------
# One-time parameter preprocessing (keep OFF the per-call path)
# ---------------------------------------------------------------------------
def prepare_params(params, compute_dtype=jnp.float32):
    """Convert PyTorch-convention params (W: (out,in), b: (out,)) into the packed
    kernel layout.  Call once at parameter-load time.  compute_dtype=jnp.bfloat16
    halves activation/weight DMA bytes (looser tolerance); accumulation stays f32."""
    H = params["b_all"].shape[0]
    d_obs = params["w_obs"].shape[1]
    d_p1 = params["w_p1"].shape[1]
    d_p2 = params["w_p2"].shape[1]
    D = d_obs + d_p1 + d_p2

    # Block-diagonal fused input weight: (D, 3H) — exact concat semantics.
    w_in = jnp.zeros((D, 3 * H), jnp.float32)
    w_in = w_in.at[:d_obs, :H].set(params["w_obs"].T)
    w_in = w_in.at[d_obs:d_obs + d_p1, H:2 * H].set(params["w_p1"].T)
    w_in = w_in.at[d_obs + d_p1:, 2 * H:].set(params["w_p2"].T)
    b_in = jnp.concatenate(
        [params["b_obs"], params["b_p1"], params["b_p2"]]).reshape(1, 3 * H)

    return dict(
        w_in=w_in.astype(compute_dtype),
        b_in=b_in.astype(jnp.float32),
        w_all=params["w_all"].T.astype(compute_dtype),           # (3H, H)
        b_all=params["b_all"].reshape(1, H).astype(jnp.float32),
        w_out=params["w_out"].reshape(1, H).astype(jnp.float32),  # (1, H) row
        b_out=params["b_out"].reshape(1, 1).astype(jnp.float32),  # scalar -> SMEM
    )


# ---------------------------------------------------------------------------
# Wrapper
# ---------------------------------------------------------------------------
def _round_up(x, m):
    return ((x + m - 1) // m) * m


def _choose_tile(batch, tb_max):
    """Batch tile: multiple of 8, capped at tb_max, and — whenever batch > 8 —
    sized so the grid has >= 2 steps (keeps both v7x TensorCores busy)."""
    if batch <= 8:
        return batch                                   # block dim == full dim is legal
    return min(tb_max, _round_up(pl.cdiv(batch, 2), 8))


@functools.partial(jax.jit, static_argnames=("tb_max",))
def multi_critic_mlp(obs, p1_act, p2_act, prepared, *, tb_max=2048):
    B = obs.shape[0]
    d_obs, d_p1, d_p2 = obs.shape[1], p1_act.shape[1], p2_act.shape[1]
    cdt = prepared["w_in"].dtype
    H3 = prepared["w_in"].shape[1]
    H = prepared["w_all"].shape[1]

    TB = _choose_tile(B, tb_max)
    num_tiles = pl.cdiv(B, TB)

    resident = lambda i: (0, 0)          # weights/biases pinned in VMEM across the grid

    out_slab = pl.pallas_call(
        _critic_kernel,
        out_shape=jax.ShapeDtypeStruct((num_tiles, 1, TB), jnp.float32),
        grid=(num_tiles,),
        in_specs=[
            pl.BlockSpec((TB, d_obs), lambda i: (i, 0)),    # obs stream (pipelined)
            pl.BlockSpec((TB, d_p1), lambda i: (i, 0)),     # p1_act stream
            pl.BlockSpec((TB, d_p2), lambda i: (i, 0)),     # p2_act stream
            pl.BlockSpec((d_obs + d_p1 + d_p2, H3), resident),  # fused input weight
            pl.BlockSpec((1, H3), resident),                # fused input bias
            pl.BlockSpec((H3, H), resident),                # all_hidden_layer weight
            pl.BlockSpec((1, H), resident),                 # all_hidden_layer bias
            pl.BlockSpec((1, H), resident),                 # output weight row
            pl.BlockSpec(memory_space=pltpu.MemorySpace.SMEM),  # output bias scalar
        ],
        out_specs=pl.BlockSpec((1, 1, TB), lambda i: (i, 0, 0)),   # lane-dense row per tile
        compiler_params=pltpu.CompilerParams(
            dimension_semantics=("parallel",),              # megacore split on v7x
            vmem_limit_bytes=32 * 1024 * 1024,              # room for TB=2048 double-buffers
        ),
    )(obs.astype(cdt), p1_act.astype(cdt), p2_act.astype(cdt),
      prepared["w_in"], prepared["b_in"], prepared["w_all"],
      prepared["b_all"], prepared["w_out"], prepared["b_out"])

    # (num_tiles, 1, TB) lane-dense slab -> (B, 1); padded tail rows are sliced off.
    return out_slab.reshape(-1, 1)[:B]


# ---------------------------------------------------------------------------
# Pure-JAX reference (mirrors the PyTorch module exactly)
# ---------------------------------------------------------------------------
def _reference(obs, p1_act, p2_act, params):
    obs_h = obs @ params["w_obs"].T + params["b_obs"]
    p1_h = p1_act @ params["w_p1"].T + params["b_p1"]
    p2_h = p2_act @ params["w_p2"].T + params["b_p2"]
    x = jnp.concatenate([obs_h, p1_h, p2_h], axis=-1)
    x = jnp.maximum(x, 0.0)
    x = x @ params["w_all"].T + params["b_all"]
    x = jnp.maximum(x, 0.0)
    return x @ params["w_out"].T + params["b_out"]


def _init_params(key, obs_sp, p1_act_sp, p2_act_sp, hidden):
    """Deterministic synthetic init mirroring the layer shapes (PyTorch (out,in) convention)."""
    ks = jax.random.split(key, 10)

    def lin(kw, kb, out_f, in_f, lim):
        w = jax.random.uniform(kw, (out_f, in_f), jnp.float32, -lim, lim)
        b = jax.random.uniform(kb, (out_f,), jnp.float32, -lim, lim)
        return w, b

    w_obs, b_obs = lin(ks[0], ks[1], hidden, obs_sp, 1.0 / jnp.sqrt(obs_sp))
    w_p1, b_p1 = lin(ks[2], ks[3], hidden, p1_act_sp, 1.0 / jnp.sqrt(p1_act_sp))
    w_p2, b_p2 = lin(ks[4], ks[5], hidden, p2_act_sp, 1.0 / jnp.sqrt(p2_act_sp))
    w_all, b_all = lin(ks[6], ks[7], hidden, 3 * hidden, 1.0 / jnp.sqrt(3 * hidden))
    w_out, b_out = lin(ks[8], ks[9], 1, hidden, 0.003)
    return dict(w_obs=w_obs, b_obs=b_obs, w_p1=w_p1, b_p1=b_p1,
                w_p2=w_p2, b_p2=b_p2, w_all=w_all, b_all=b_all,
                w_out=w_out, b_out=b_out)


if __name__ == "__main__":
    key = jax.random.PRNGKey(0)
    k_obs, k_p1, k_p2, k_params, k_big = jax.random.split(key, 5)

    OBS_SP, P1_SP, P2_SP, HIDDEN = 16, 6, 6, 64   # hidden_size matches the module default
    params = _init_params(k_params, OBS_SP, P1_SP, P2_SP, HIDDEN)
    prepared = prepare_params(params)             # one-time packing, off the per-call path

    # --- small-shape check (single tile) ---
    B = 8
    obs = jax.random.normal(k_obs, (B, OBS_SP), jnp.float32)
    p1_act = jax.random.normal(k_p1, (B, P1_SP), jnp.float32)
    p2_act = jax.random.normal(k_p2, (B, P2_SP), jnp.float32)

    out = jax.block_until_ready(multi_critic_mlp(obs, p1_act, p2_act, prepared))
    ref = _reference(obs, p1_act, p2_act, params)
    assert out.shape == (B, 1)
    assert jnp.allclose(out, ref, atol=2e-5, rtol=1e-4), "Pallas kernel mismatch (small batch)"

    # --- larger, non-multiple batch: 2 grid steps, partial last tile, slab slicing ---
    B2 = 1000
    kb1, kb2, kb3 = jax.random.split(k_big, 3)
    obs2 = jax.random.normal(kb1, (B2, OBS_SP), jnp.float32)
    p1_2 = jax.random.normal(kb2, (B2, P1_SP), jnp.float32)
    p2_2 = jax.random.normal(kb3, (B2, P2_SP), jnp.float32)

    out2 = jax.block_until_ready(multi_critic_mlp(obs2, p1_2, p2_2, prepared))
    ref2 = _reference(obs2, p1_2, p2_2, params)
    assert out2.shape == (B2, 1)
    assert jnp.allclose(out2, ref2, atol=2e-5, rtol=1e-4), "Pallas kernel mismatch (tiled batch)"

    print("KERNEL_OK")
</pallas_src>

<mosaic_0001>
module attributes {stable_mosaic.version = 11 : i64} {
  func.func @_critic_kernel(%arg0: i32, %arg1: memref<8x16xf32, #tpu.memory_space<vmem>>, %arg2: memref<8x6xf32, #tpu.memory_space<vmem>>, %arg3: memref<8x6xf32, #tpu.memory_space<vmem>>, %arg4: memref<28x192xf32, #tpu.memory_space<vmem>>, %arg5: memref<1x192xf32, #tpu.memory_space<vmem>>, %arg6: memref<192x64xf32, #tpu.memory_space<vmem>>, %arg7: memref<1x64xf32, #tpu.memory_space<vmem>>, %arg8: memref<1x64xf32, #tpu.memory_space<vmem>>, %arg9: memref<1x1xf32, #tpu.memory_space<smem>>, %arg10: memref<1x1x8xf32, #tpu.memory_space<vmem>>) attributes {dimension_semantics = [#tpu.dimension_semantics<parallel>], iteration_bounds = array<i64: 1>, scalar_prefetch = 0 : i64, scratch_operands = 0 : i64, tpu.core_type = #tpu.core_type<tc>, window_params = [{transform_indices = @transform_0, window_bounds = array<i64: 8, 16>}, {transform_indices = @transform_1, window_bounds = array<i64: 8, 6>}, {transform_indices = @transform_2, window_bounds = array<i64: 8, 6>}, {pipeline_mode = #tpu.pipeline_mode<synchronous>, transform_indices = @transform_3, window_bounds = array<i64: 28, 192>}, {pipeline_mode = #tpu.pipeline_mode<synchronous>, transform_indices = @transform_4, window_bounds = array<i64: 1, 192>}, {pipeline_mode = #tpu.pipeline_mode<synchronous>, transform_indices = @transform_5, window_bounds = array<i64: 192, 64>}, {pipeline_mode = #tpu.pipeline_mode<synchronous>, transform_indices = @transform_6, window_bounds = array<i64: 1, 64>}, {pipeline_mode = #tpu.pipeline_mode<synchronous>, transform_indices = @transform_7, window_bounds = array<i64: 1, 64>}, {transform_indices = @transform_8, window_bounds = array<i64: 1, 1>}, {transform_indices = @transform_9, window_bounds = array<i64: 1, 1, 8>}]} {
    %c0 = arith.constant 0 : index
    %c0_0 = arith.constant 0 : index
    %0 = vector.load %arg1[%c0, %c0_0] : memref<8x16xf32, #tpu.memory_space<vmem>>, vector<8x16xf32>
    %c0_1 = arith.constant 0 : index
    %c0_2 = arith.constant 0 : index
    %1 = vector.load %arg2[%c0_1, %c0_2] : memref<8x6xf32, #tpu.memory_space<vmem>>, vector<8x6xf32>
    %c0_3 = arith.constant 0 : index
    %c0_4 = arith.constant 0 : index
    %2 = vector.load %arg3[%c0_3, %c0_4] : memref<8x6xf32, #tpu.memory_space<vmem>>, vector<8x6xf32>
    %3 = tpu.concatenate %0, %1, %2 in 1 : vector<8x16xf32>, vector<8x6xf32>, vector<8x6xf32> -> vector<8x28xf32>
    %c0_5 = arith.constant 0 : index
    %c0_6 = arith.constant 0 : index
    %4 = vector.load %arg4[%c0_5, %c0_6] : memref<28x192xf32, #tpu.memory_space<vmem>>, vector<28x192xf32>
    %cst = arith.constant dense<0.000000e+00> : vector<8x192xf32>
    %5 = tpu.matmul %3, %4, %cst {dimension_numbers = #tpu.dot_dimension_numbers<[1], [0], [0], [1], [0, 0, 1, 1], [], []>} : vector<8x28xf32>, vector<28x192xf32>, vector<8x192xf32> -> vector<8x192xf32>
    %c0_7 = arith.constant 0 : index
    %c0_8 = arith.constant 0 : index
    %6 = vector.load %arg5[%c0_7, %c0_8] : memref<1x192xf32, #tpu.memory_space<vmem>>, vector<1x192xf32>
    %7 = vector.broadcast %6 : vector<1x192xf32> to vector<8x192xf32>
    %8 = arith.addf %5, %7 : vector<8x192xf32>
    %cst_9 = arith.constant 0.000000e+00 : f32
    %9 = vector.broadcast %cst_9 : f32 to vector<8x192xf32>
    %10 = arith.maximumf %8, %9 : vector<8x192xf32>
    %c0_10 = arith.constant 0 : index
    %c0_11 = arith.constant 0 : index
    %11 = vector.load %arg6[%c0_10, %c0_11] : memref<192x64xf32, #tpu.memory_space<vmem>>, vector<192x64xf32>
    %cst_12 = arith.constant dense<0.000000e+00> : vector<8x64xf32>
    %12 = tpu.matmul %10, %11, %cst_12 {dimension_numbers = #tpu.dot_dimension_numbers<[1], [0], [0], [1], [0, 0, 1, 1], [], []>} : vector<8x192xf32>, vector<192x64xf32>, vector<8x64xf32> -> vector<8x64xf32>
    %c0_13 = arith.constant 0 : index
    %c0_14 = arith.constant 0 : index
    %13 = vector.load %arg7[%c0_13, %c0_14] : memref<1x64xf32, #tpu.memory_space<vmem>>, vector<1x64xf32>
    %14 = vector.broadcast %13 : vector<1x64xf32> to vector<8x64xf32>
    %15 = arith.addf %12, %14 : vector<8x64xf32>
    %cst_15 = arith.constant 0.000000e+00 : f32
    %16 = vector.broadcast %cst_15 : f32 to vector<8x64xf32>
    %17 = arith.maximumf %15, %16 : vector<8x64xf32>
    %c0_16 = arith.constant 0 : index
    %c0_17 = arith.constant 0 : index
    %18 = vector.load %arg8[%c0_16, %c0_17] : memref<1x64xf32, #tpu.memory_space<vmem>>, vector<1x64xf32>
    %cst_18 = arith.constant dense<0.000000e+00> : vector<1x8xf32>
    %19 = tpu.matmul %18, %17, %cst_18 {dimension_numbers = #tpu.dot_dimension_numbers<[1], [1], [0], [0], [0, 0, 1, 0], [], []>} : vector<1x64xf32>, vector<8x64xf32>, vector<1x8xf32> -> vector<1x8xf32>
    %c0_19 = arith.constant 0 : index
    %c0_20 = arith.constant 0 : index
    %20 = memref.load %arg9[%c0_19, %c0_20] : memref<1x1xf32, #tpu.memory_space<smem>>
    %21 = vector.broadcast %20 : f32 to vector<1x8xf32>
    %22 = arith.addf %19, %21 : vector<1x8xf32>
    %23 = vector.shape_cast %22 : vector<1x8xf32> to vector<1x1x8xf32>
    %c0_21 = arith.constant 0 : index
    %c0_22 = arith.constant 0 : index
    %c0_23 = arith.constant 0 : index
    %24 = vector.load %arg10[%c0_21, %c0_22, %c0_23] : memref<1x1x8xf32, #tpu.memory_space<vmem>>, vector<1x1x8xf32>
    tpu.vector_store %arg10[%c0_21, %c0_22, %c0_23], %23 {strides = array<i32>} : memref<1x1x8xf32, #tpu.memory_space<vmem>>, vector<1x1x8xf32>,
    return
  }
  func.func @transform_0(%arg0: i32) -> (i32, i32) {
    %c0_i32 = arith.constant 0 : i32
    %c0_i32_0 = arith.constant 0 : i32
    return %arg0, %c0_i32 : i32, i32
  }
  func.func @transform_1(%arg0: i32) -> (i32, i32) {
    %c0_i32 = arith.constant 0 : i32
    %c0_i32_0 = arith.constant 0 : i32
    return %arg0, %c0_i32 : i32, i32
  }
  func.func @transform_2(%arg0: i32) -> (i32, i32) {
    %c0_i32 = arith.constant 0 : i32
    %c0_i32_0 = arith.constant 0 : i32
    return %arg0, %c0_i32 : i32, i32
  }
  func.func @transform_3(%arg0: i32) -> (i32, i32) {
    %c0_i32 = arith.constant 0 : i32
    %c0_i32_0 = arith.constant 0 : i32
    %c0_i32_1 = arith.constant 0 : i32
    return %c0_i32, %c0_i32_0 : i32, i32
  }
  func.func @transform_4(%arg0: i32) -> (i32, i32) {
    %c0_i32 = arith.constant 0 : i32
    %c0_i32_0 = arith.constant 0 : i32
    %c0_i32_1 = arith.constant 0 : i32
    return %c0_i32, %c0_i32_0 : i32, i32
  }
  func.func @transform_5(%arg0: i32) -> (i32, i32) {
    %c0_i32 = arith.constant 0 : i32
    %c0_i32_0 = arith.constant 0 : i32
    %c0_i32_1 = arith.constant 0 : i32
    return %c0_i32, %c0_i32_0 : i32, i32
  }
  func.func @transform_6(%arg0: i32) -> (i32, i32) {
    %c0_i32 = arith.constant 0 : i32
    %c0_i32_0 = arith.constant 0 : i32
    %c0_i32_1 = arith.constant 0 : i32
    return %c0_i32, %c0_i32_0 : i32, i32
  }
  func.func @transform_7(%arg0: i32) -> (i32, i32) {
    %c0_i32 = arith.constant 0 : i32
    %c0_i32_0 = arith.constant 0 : i32
    %c0_i32_1 = arith.constant 0 : i32
    return %c0_i32, %c0_i32_0 : i32, i32
  }
  func.func @transform_8(%arg0: i32) -> (i32, i32) {
    %c0_i32 = arith.constant 0 : i32
    %c0_i32_0 = arith.constant 0 : i32
    %c0_i32_1 = arith.constant 0 : i32
    return %c0_i32, %c0_i32_0 : i32, i32
  }
  func.func @transform_9(%arg0: i32) -> (i32, i32, i32) {
    %c0_i32 = arith.constant 0 : i32
    %c0_i32_0 = arith.constant 0 : i32
    %c0_i32_1 = arith.constant 0 : i32
    return %arg0, %c0_i32, %c0_i32_0 : i32, i32, i32
  }
}

</mosaic_0001>

<bundles_post_ra>
// kernel: multi_critic_mlp.1
= control target key start
LH: loop header
LB: loop body
LE: loop exit
PB: predicated region body
PF: predicated region fallthrough
CT: control target
= control target key end

     0   :  { %s273_s11 = smov 16   ;;  %s446_s0 = inlined_call_operand.vmem [shape: f32[8,16], index: 0, kind: input, shape index: {}]   ;;  %s447_s1 = inlined_call_operand.vmem [shape: f32[8,6], index: 1, kind: input, shape index: {}]   ;;  %s448_s2 = inlined_call_operand.vmem [shape: f32[8,6], index: 2, kind: input, shape index: {}]   ;;  %s449_s3 = inlined_call_operand.vmem [shape: f32[28,192], index: 3, kind: input, shape index: {}]   ;;  %s450_s4 = inlined_call_operand.vmem [shape: f32[1,192], index: 4, kind: input, shape index: {}]   ;;  %s451_s5 = inlined_call_operand.vmem [shape: f32[192,64], index: 5, kind: input, shape index: {}]   ;;  %s452_s6 = inlined_call_operand.vmem [shape: f32[1,64], index: 6, kind: input, shape index: {}]   ;;  %s453_s7 = inlined_call_operand.vmem [shape: f32[1,64], index: 7, kind: input, shape index: {}]   ;;  %s454_s8 = inlined_call_operand.<no memory space> [shape: f32[1,1], index: 8, kind: input, shape index: {}]   ;;  %s455_s9 = inlined_call_operand.hbm [shape: f32[1,1,8], index: 9, kind: output, shape index: {}]  }
   0x1   :  { %v35_v0 = vld [vmem:[%s447_s1] sm:$0xff] }
   0x2   :  { %38 = vrot.lane.b32.xlu0 %v35_v0, %s273_s11 }
   0x3   :  { %15 = vsyncpa [#allocation4], 0  ;;  %v36_v1 = vld [vmem:[%s448_s2] sm:$0xff]  ;;  %s274_s14 = smov 22   ;;  %v55_v2 = vld [vmem:[%s449_s3 + $0x30] sm:$0xf]  ;;  %v191_v55 = vstv %s454_s8 }
   0x4   :  { %vm67_vm0 = vcmask 1043456   ;;  %v56_v3 = vld [vmem:[%s449_s3 + $0x38] sm:$0xf]  ;;  %v53_v4 = vld [vmem:[%s449_s3 + $0x20] sm:$0xff]  ;;  %v54_v5 = vld [vmem:[%s449_s3 + $0x28] sm:$0xff]  ;;  %vm45_vm1 = vcmask 130048  }
   0x5   :  { %236 = vmatpush.msk.msra.mxu0 %vm67_vm0, %v55_v2  ;;  %238 = vmatpush.msk.msra.mxu1 %vm67_vm0, %v56_v3  ;;  %v51_v6 = vld [vmem:[%s449_s3 + $0x10] sm:$0xff]  ;;  %v52_v7 = vld [vmem:[%s449_s3 + $0x18] sm:$0xff]  ;;  %v49_v8 = vld [vmem:[%s449_s3] sm:$0xff]  ;;  %vm47_vm2 = vcmask 179200   ;;  %vm63_vm3 = vcmask 228352   ;;  %vm144_vm4 = vcmask 523264  }
   0x6   :  { %v50_v9 = vld [vmem:[%s449_s3 + $0x8] sm:$0xff]  ;;  %v131_v10 = vld [vmem:[%s451_s5 + $0x78] sm:$0xff]  ;;  %v130_v11 = vld [vmem:[%s451_s5 + $0x70] sm:$0xff]  ;;  %s275_s15 = smov [#allocation3]   ;;  %vm218_vm5 = vcmask 57344  }
   0x7   :  { %87 = vmatpush.msra.mxu0 %v53_v4  ;;  %107 = vmatpush.msra.mxu1 %v54_v5  ;;  %v129_v12 = vld [vmem:[%s451_s5 + $0x68] sm:$0xff]  ;;  %v139_v13 = vld [vmem:[%s451_s5 + $0xb8] sm:$0xff]  ;;  %v138_v14 = vld [vmem:[%s451_s5 + $0xb0] sm:$0xff]  ;;  %s225_s3 = sshll.u32 %s275_s15, 4  ;;  %s226_s3 = int_to_ptr.vmem [resolvable:$true] %s225_s3 }
   0x8   :  { %148 = vmatpush.msra.mxu2 %v131_v10  ;;  %v128_v15 = vld [vmem:[%s451_s5 + $0x60] sm:$0xff]  ;;  %176 = vmatpush.msra.mxu3 %v139_v13  ;;  %v137_v16 = vld [vmem:[%s451_s5 + $0xa8] sm:$0xff]  ;;  %v127_v17 = vld [vmem:[%s451_s5 + $0x58] sm:$0xff] }
   0x9   :  { %88 = vmatpush.msra.mxu0 %v51_v6  ;;  %108 = vmatpush.msra.mxu1 %v52_v7  ;;  %v136_v18 = vld [vmem:[%s451_s5 + $0xa0] sm:$0xff]  ;;  %v126_v19 = vld [vmem:[%s451_s5 + $0x50] sm:$0xff]  ;;  %v135_v20 = vld [vmem:[%s451_s5 + $0x98] sm:$0xff] }
   0xa   :  { %42 = vrot.lane.b32.xlu0 %v36_v1, %s274_s14  ;;  %149 = vmatpush.msra.mxu2 %v130_v11  ;;  %v125_v21 = vld [vmem:[%s451_s5 + $0x48] sm:$0xff]  ;;  %v124_v22 = vld [vmem:[%s451_s5 + $0x40] sm:$0xff]  ;;  %v123_v23 = vld [vmem:[%s451_s5 + $0x38] sm:$0xff] }
   0xb   :  { %89 = vmatpush.msra.mxu0 %v49_v8  ;;  %109 = vmatpush.msra.mxu1 %v50_v9  ;;  %v122_v24 = vld [vmem:[%s451_s5 + $0x30] sm:$0xff]  ;;  %v121_v25 = vld [vmem:[%s451_s5 + $0x28] sm:$0xff]  ;;  %v120_v26 = vld [vmem:[%s451_s5 + $0x20] sm:$0xff] }
   0xc   :  { %150 = vmatpush.msra.mxu2 %v129_v12  ;;  %177 = vmatpush.msra.mxu3 %v138_v14  ;;  %v119_v28 = vld [vmem:[%s451_s5 + $0x18] sm:$0xff]  ;;  %v34_v29 = vld [vmem:[%s446_s0] sm:$0xff]  ;;  %v118_v33 = vld [vmem:[%s451_s5 + $0x10] sm:$0xff] }
   0xd   :  { %v134_v34 = vld [vmem:[%s451_s5 + $0x90] sm:$0xff]  ;;  %v117_v35 = vld [vmem:[%s451_s5 + $0x8] sm:$0xff]  ;;  %v116_v37 = vld [vmem:[%s451_s5] sm:$0xff] }
   0xe   :  { %151 = vmatpush.msra.mxu2 %v128_v15  ;;  %178 = vmatpush.msra.mxu3 %v137_v16  ;;  %v133_v36 = vld [vmem:[%s451_s5 + $0x88] sm:$0xff]  ;;  %v132_v38 = vld [vmem:[%s451_s5 + $0x80] sm:$0xff] }
   0xf   :  { %v57_v39 = vld [vmem:[%s450_s4] sm:$0x3] }
  0x10   :  { %152 = vmatpush.msra.mxu2 %v127_v17  ;;  %179 = vmatpush.msra.mxu3 %v136_v18  ;;  %v59_v40 = vperm.slane %v57_v39, 0  ;;  %v60_v41 = vperm.slane %v57_v39, 1  ;;  %v246_v48 = vld [vmem:[%s452_s6] ss:$0 sm:$0xff]  ;;  %s227_s6 = sshll.u32 %s455_s9, 4  ;;  %s228_s6 = int_to_ptr.hbm [resolvable:$true] %s227_s6 }
  0x11   :  { %v189_v54 = vld [vmem:[%s453_s7] sm:$0x1] }
  0x12   :  { %153 = vmatpush.msra.mxu2 %v126_v19  ;;  %180 = vmatpush.msra.mxu3 %v135_v20 }
  0x14   :  { %154 = vmatpush.msra.mxu2 %v125_v21  ;;  %181 = vmatpush.msra.mxu3 %v134_v34 }
  0x16   :  { %155 = vmatpush.msra.mxu2 %v124_v22  ;;  %182 = vmatpush.msra.mxu3 %v133_v36 }
  0x18   :  { %156 = vmatpush.msra.mxu2 %v123_v23  ;;  %183 = vmatpush.msra.mxu3 %v132_v38 }
  0x1a   :  { %157 = vmatpush.msra.mxu2 %v122_v24 }
  0x1c   :  { %158 = vmatpush.msra.mxu2 %v121_v25 }
  0x1e   :  { %159 = vmatpush.msra.mxu2 %v120_v26 }
  0x20   :  { %160 = vmatpush.msra.mxu2 %v119_v28 }
  0x22   :  { %161 = vmatpush.msra.mxu2 %v118_v33 }
  0x24   :  { %162 = vmatpush.msra.mxu2 %v117_v35 }
  0x26   :  { %163 = vmatpush.msra.mxu2 %v116_v37 }
  0x74   :  { %v39_v27 = vpop.permute.xlu0 %38 }
  0x75   :  { %v46_v30 = vsel %vm45_vm1, %v34_v29, %v39_v27 }
  0x7c   :  { %v43_v31 = vpop.permute.xlu0 %42 }
  0x7d   :  { %v48_v32 = vsel %vm47_vm2, %v46_v30, %v43_v31 }
  0x7e   :  { %237 = vmatmul.msk.f32.vlgmr.msra.gmra.mxu0 %vm63_vm3, %v48_v32  ;;  %239 = vmatmul.msk.f32.vlgmr.msra.gmra.mxu1 %vm63_vm3, %v48_v32 }
  0xfb   :  { %v91_v42 = vpop.f32.mrf.mxu0  ;;  %v111_v43 = vpop.f32.mrf.mxu1 }
  0xfc   :  { %v92_v44 = vadd.f32 %v91_v42, %v59_v40  ;;  %v112_v45 = vadd.f32 %v111_v43, %v60_v41 }
  0xfe   :  { %v114_v46 = vmax.f32 %v92_v44, 0.0  ;;  %v115_v47 = vmax.f32 %v112_v45, 0.0 }
 0x100   :  { %164 = vmatmul.f32.vlgmr.msra.gmra.mxu2 %v114_v46  ;;  %240 = vmatmul.msk.f32.vlgmr.msra.gmra.mxu3 %vm144_vm4, %v115_v47 }
 0x183   :  { %v165_v49 = vpop.f32.mrf.mxu2  ;;  %v185_v51 = vpop.f32.mrf.mxu3 }
 0x184   :  { %v166_v50 = vadd.f32 %v246_v48, %v165_v49 }
 0x186   :  { %v186_v52 = vadd.f32 %v185_v51, %v166_v50 }
 0x188   :  { %v188_v53 = vmax.f32 %v186_v52, 0.0 }
 0x18a   :  { %241 = vmatpush.xpose.msk.msrb.mxu0 %vm144_vm4, %v188_v53 }
 0x18d   :  { %242 = vmatmul.msk.f32.vlgmr.msrb.gmra.mxu0 %vm144_vm4, %v189_v54 }
 0x20a   :  { %v215_v56 = vpop.f32.mrf.mxu0 }
 0x20b   :  { %v216_v57 = vadd.f32 %v215_v56, %v191_v55 }
 0x20d   :  { %219 = vst.msk [vmem:[#allocation3] sm:$0x1] %vm218_vm5, %v216_v57 }
 0x20e   :  { %230 = dma.vmem_to_hbm [thread:$0]  %s226_s3, 16, %s228_s6, [#allocation4]  }
 0x20f   :  { %271 = dma.done.wait [#allocation4], 16  }
 0x210   :  { %272 = vsyncadd [#allocation4], 4294967280 }
 0x211   :  { %235 = vsyncpa [#allocation4], 1 }

</bundles_post_ra>
